<compile_context>
chip_gen: v7x
topology: tpu7x:2x2x1
jax: 0.10.0
libtpu: 0.0.40
codegen_flags: <defaults>
</compile_context>

<pallas_src>
import functools

import jax
import jax.numpy as jnp
from jax import lax
from jax.experimental import pallas as pl
from jax.experimental.pallas import tpu as pltpu


def _cdiv(a, b):
    return -(-a // b)


def _ceil_to(x, m):
    return _cdiv(x, m) * m


# ----------------------------- Pallas kernel --------------------------------

def _sparsify2d_all_kernel(x_ref, o_ref, mask_ref, *, k, bn, c, use_mxu_rank):
    # x_ref block: (Bn, C, HW) -> Bn full samples resident in VMEM.
    # Loop-invariant index helpers hoisted out of the sample loop
    # (JAX does not CSE broadcast_in_dim).
    row = lax.broadcasted_iota(jnp.int32, (c, c), 0)        # channel c  (sublane)
    col = lax.broadcasted_iota(jnp.int32, (c, c), 1)        # channel c' (lane)
    diag = row == col
    col_lt_row = col < row
    ones_col = jnp.ones((c, 1), jnp.bfloat16) if use_mxu_rank else None

    def body(b, carry):
        xb = x_ref[b]                                        # (C, HW)
        dt = xb.dtype

        # Per-channel spatial max: lane reduction -> column-oriented (C, 1).
        m = jnp.max(xb, axis=1, keepdims=True)

        # Lane-oriented copy of m (m_row[0, j] = m[j]) via diagonal-select +
        # sublane max; avoids an explicit tiny transpose.
        neg = jnp.array(-jnp.inf, dt)
        m_row = jnp.max(jnp.where(diag, jnp.broadcast_to(m, (c, c)), neg),
                        axis=0, keepdims=True)               # (1, C)

        # beats[c, c'] = channel c' beats channel c (strictly larger max, or
        # equal max with a lower index) -> rank[c] = #channels beating c.
        # Channel kept iff rank < k  <=>  among the top-k (torch.topk ties).
        beats = (m_row > m) | ((m_row == m) & col_lt_row)    # (C, C)
        if use_mxu_rank:
            # Large C: push the O(C^2) reduction onto the MXU to avoid
            # lane-summing a huge int32 matrix (vreg pressure / VALU load).
            rank = jnp.dot(beats.astype(jnp.bfloat16), ones_col,
                           preferred_element_type=jnp.float32)   # (C, 1)
            keep_bool = rank < float(k)
        else:
            rank = jnp.sum(beats.astype(jnp.int32), axis=1, keepdims=True)
            keep_bool = rank < k                              # (C, 1)
        keep_col = keep_bool.astype(dt)                       # (C, 1)

        # Masked sample: broadcast over the HW lane axis; lane-dense store.
        o_ref[b] = xb * keep_col

        # Lane-oriented selection mask, derived from keep_bool (no second
        # ranking pass): diag-select + sublane max.
        keep_row = jnp.max(
            jnp.where(diag,
                      jnp.broadcast_to(keep_bool.astype(jnp.float32), (c, c)),
                      0.0),
            axis=0, keepdims=True)                            # (1, C)
        mask_ref[b] = keep_row
        return carry

    lax.fori_loop(0, bn, body, 0, unroll=(bn <= 8))


# ------------------------------- wrapper -------------------------------------

def _pick_bn(n, sample_bytes, target_bytes):
    """Samples per grid step: ~target_bytes input block, >=2 grid steps,
    exact divisor of n (no partial blocks)."""
    bn = max(1, min(n, target_bytes // max(sample_bytes, 1)))
    if n >= 2:
        bn = min(bn, _cdiv(n, 2))       # keep both v7x TensorCores busy
    bn = int(bn)
    for d in range(bn, 0, -1):
        if n % d == 0:
            return d
    return 1


def sparsify2d_all(x, sparse_ratio=0.5):
    """Fused Sparsify2D_all forward.

    x: (N, C, H, W).  Returns (out, mask) with out = mask-broadcast * x and
    mask: (N, C) float {0,1} channel-selection mask (act_count = mask.sum(0)).
    """
    N, C, H, W = x.shape
    HW = H * W
    k = int(sparse_ratio * C)            # static, exactly as in the module

    x2 = x.reshape(N, C, HW)             # free reshape: H, W already contiguous

    # Per-sample VMEM footprint including lane/sublane padding (HW may not be
    # a multiple of 128 for late ResNet stages: 49 / 196 / 784).
    itemsize = x.dtype.itemsize
    sample_bytes = _ceil_to(C, 8) * _ceil_to(HW, 128) * itemsize
    bn = _pick_bn(N, sample_bytes, target_bytes=2 * 1024 * 1024)
    grid = (N // bn,)                    # exact by construction
    # TODO(synk): when HW % 128 != 0 (7x7/14x14 maps) lanes are padded and
    # stores become masked; a (C/2, 2*HW) half-lane fold would recover density.

    # Generation-aware VMEM budget: double-buffered in/out/mask blocks plus
    # the (C, C) ranking intermediates, capped at 75% of physical VMEM.
    in_blk = bn * sample_bytes
    mask_blk = bn * 8 * _ceil_to(C, 128) * 4
    inter = 8 * _ceil_to(C, 8) * _ceil_to(C, 128) * 4
    need = 4 * in_blk + 2 * mask_blk + inter + (1 << 20)
    try:
        cap = int(0.75 * pltpu.get_tpu_info().vmem_capacity_bytes)
    except Exception:  # pragma: no cover - conservative fallback (v7x = 64 MiB)
        cap = 48 * 1024 * 1024
    vmem_limit = int(min(cap, max(16 * 1024 * 1024, need)))

    out, mask = pl.pallas_call(
        functools.partial(_sparsify2d_all_kernel, k=k, bn=bn, c=C,
                          use_mxu_rank=(C >= 256)),
        out_shape=(jax.ShapeDtypeStruct((N, C, HW), x.dtype),
                   jax.ShapeDtypeStruct((N, 1, C), jnp.float32)),
        grid_spec=pltpu.PrefetchScalarGridSpec(
            num_scalar_prefetch=0,
            grid=grid,
            in_specs=[pl.BlockSpec((bn, C, HW), lambda n: (n, 0, 0))],
            out_specs=(pl.BlockSpec((bn, C, HW), lambda n: (n, 0, 0)),
                       pl.BlockSpec((bn, 1, C), lambda n: (n, 0, 0)))),
        compiler_params=pltpu.CompilerParams(
            dimension_semantics=("parallel",),
            vmem_limit_bytes=vmem_limit),
    )(x2)
    # TODO(synk): if one (Bn=1, C, HW) sample ever exceeds VMEM, split the
    # spatial axis with a 2-phase grid (max-reduce pass, then mask-mul pass).
    return out.reshape(N, C, H, W), mask.reshape(N, C)


# --------------------------- pure-JAX reference -------------------------------

def _sparsify2d_all_ref(x, sparse_ratio=0.5):
    """Mirrors the PyTorch forward (topk over per-channel spatial maxima)."""
    N, C, H, W = x.shape
    k = int(sparse_ratio * C)
    tmpx = x.reshape(N, C, H * W)
    topvalues = jnp.max(tmpx, axis=2)                       # (N, C)
    _, indices = jax.lax.top_k(topvalues, k)                # (N, k)
    mask = jnp.zeros((N, C), jnp.float32)
    mask = mask.at[jnp.arange(N)[:, None], indices].set(1.0)
    return x * mask[:, :, None, None], mask


# ----------------------------------- main -------------------------------------

if __name__ == "__main__":
    key = jax.random.PRNGKey(0)
    batch, channels, spatial = 4, 64, 16
    sparse_ratio = 0.5
    x = jax.random.normal(key, (batch, channels, spatial, spatial), jnp.float32)

    run = jax.jit(lambda v: sparsify2d_all(v, sparse_ratio=sparse_ratio))
    out, mask = run(x)
    out = jax.block_until_ready(out)
    act_count = mask.sum(axis=0)            # == self.act_count after one forward

    ref_out, ref_mask = _sparsify2d_all_ref(x, sparse_ratio)
    k = int(sparse_ratio * channels)

    assert out.shape == x.shape
    assert jnp.allclose(out, ref_out, atol=1e-6, rtol=1e-6)
    assert jnp.array_equal(mask, ref_mask)
    assert jnp.array_equal(mask.sum(axis=1),
                           jnp.full((batch,), float(k), mask.dtype))
    assert act_count.shape == (channels,)

    # TODO(synk): SparsifyBase.record_activation forward hooks (.cpu()/.detach()
    # activation caching) are host-side bookkeeping and are not implemented.
    print("KERNEL_OK")
</pallas_src>

<mosaic_0001>
module attributes {stable_mosaic.version = 11 : i64} {
  func.func @_sparsify2d_all_kernel(%arg0: i32, %arg1: memref<2x64x256xf32, #tpu.memory_space<vmem>>, %arg2: memref<2x64x256xf32, #tpu.memory_space<vmem>>, %arg3: memref<2x1x64xf32, #tpu.memory_space<vmem>>) attributes {dimension_semantics = [#tpu.dimension_semantics<parallel>], iteration_bounds = array<i64: 2>, scalar_prefetch = 0 : i64, scratch_operands = 0 : i64, tpu.core_type = #tpu.core_type<tc>, window_params = [{transform_indices = @transform_0, window_bounds = array<i64: 2, 64, 256>}, {transform_indices = @transform_1, window_bounds = array<i64: 2, 64, 256>}, {transform_indices = @transform_2, window_bounds = array<i64: 2, 1, 64>}]} {
    %0 = tpu.iota {dimensions = array<i32: 0>} : vector<64x64xi32>
    %1 = tpu.iota {dimensions = array<i32: 1>} : vector<64x64xi32>
    %2 = arith.cmpi eq, %0, %1 : vector<64x64xi32>
    %3 = arith.cmpi slt, %1, %0 : vector<64x64xi32>
    %c0_i32 = arith.constant 0 : i32
    %4 = arith.index_cast %c0_i32 : i32 to index
    %c0 = arith.constant 0 : index
    %c0_0 = arith.constant 0 : index
    %5 = vector.load %arg1[%4, %c0, %c0_0] : memref<2x64x256xf32, #tpu.memory_space<vmem>>, vector<1x64x256xf32>
    %6 = vector.shape_cast %5 : vector<1x64x256xf32> to vector<64x256xf32>
    %cst = arith.constant dense<0xFF800000> : vector<64xf32>
    %7 = vector.multi_reduction <maximumf>, %6, %cst [1] : vector<64x256xf32> to vector<64xf32>
    %8 = vector.shape_cast %7 : vector<64xf32> to vector<64x1xf32>
    %9 = vector.shape_cast %8 : vector<64x1xf32> to vector<64x1xf32>
    %10 = vector.broadcast %9 : vector<64x1xf32> to vector<64x64xf32>
    %cst_1 = arith.constant 0xFF800000 : f32
    %11 = vector.broadcast %cst_1 : f32 to vector<64x64xf32>
    %12 = arith.select %2, %10, %11 : vector<64x64xi1>, vector<64x64xf32>
    %cst_2 = arith.constant dense<0xFF800000> : vector<64xf32>
    %13 = vector.multi_reduction <maximumf>, %12, %cst_2 [0] : vector<64x64xf32> to vector<64xf32>
    %14 = vector.shape_cast %13 : vector<64xf32> to vector<1x64xf32>
    %15 = vector.broadcast %14 : vector<1x64xf32> to vector<64x64xf32>
    %16 = vector.broadcast %8 : vector<64x1xf32> to vector<64x64xf32>
    %17 = arith.cmpf ogt, %15, %16 : vector<64x64xf32>
    %18 = vector.broadcast %14 : vector<1x64xf32> to vector<64x64xf32>
    %19 = vector.broadcast %8 : vector<64x1xf32> to vector<64x64xf32>
    %20 = arith.cmpf oeq, %18, %19 : vector<64x64xf32>
    %21 = arith.andi %20, %3 : vector<64x64xi1>
    %22 = arith.ori %17, %21 : vector<64x64xi1>
    %23 = arith.extui %22 : vector<64x64xi1> to vector<64x64xi32>
    %cst_3 = arith.constant dense<0> : vector<64xi32>
    %24 = vector.multi_reduction <add>, %23, %cst_3 [1] : vector<64x64xi32> to vector<64xi32>
    %25 = vector.shape_cast %24 : vector<64xi32> to vector<64x1xi32>
    %c32_i32 = arith.constant 32 : i32
    %26 = vector.broadcast %c32_i32 : i32 to vector<64x1xi32>
    %27 = arith.cmpi slt, %25, %26 : vector<64x1xi32>
    %28 = arith.extui %27 : vector<64x1xi1> to vector<64x1xi32>
    %29 = arith.sitofp %28 : vector<64x1xi32> to vector<64x1xf32>
    %30 = vector.broadcast %29 : vector<64x1xf32> to vector<64x256xf32>
    %31 = arith.mulf %6, %30 : vector<64x256xf32>
    %32 = arith.index_cast %c0_i32 : i32 to index
    %c0_4 = arith.constant 0 : index
    %c0_5 = arith.constant 0 : index
    %33 = vector.load %arg2[%32, %c0_4, %c0_5] : memref<2x64x256xf32, #tpu.memory_space<vmem>>, vector<1x64x256xf32>
    %34 = vector.shape_cast %33 : vector<1x64x256xf32> to vector<64x256xf32>
    %35 = vector.shape_cast %31 : vector<64x256xf32> to vector<1x64x256xf32>
    tpu.vector_store %arg2[%32, %c0_4, %c0_5], %35 {strides = array<i32>} : memref<2x64x256xf32, #tpu.memory_space<vmem>>, vector<1x64x256xf32>,
    %36 = arith.extui %27 : vector<64x1xi1> to vector<64x1xi32>
    %37 = arith.sitofp %36 : vector<64x1xi32> to vector<64x1xf32>
    %38 = vector.shape_cast %37 : vector<64x1xf32> to vector<64x1xf32>
    %39 = vector.broadcast %38 : vector<64x1xf32> to vector<64x64xf32>
    %cst_6 = arith.constant 0.000000e+00 : f32
    %40 = vector.broadcast %cst_6 : f32 to vector<64x64xf32>
    %41 = arith.select %2, %39, %40 : vector<64x64xi1>, vector<64x64xf32>
    %cst_7 = arith.constant dense<0xFF800000> : vector<64xf32>
    %42 = vector.multi_reduction <maximumf>, %41, %cst_7 [0] : vector<64x64xf32> to vector<64xf32>
    %43 = vector.shape_cast %42 : vector<64xf32> to vector<1x64xf32>
    %44 = arith.index_cast %c0_i32 : i32 to index
    %c0_8 = arith.constant 0 : index
    %c0_9 = arith.constant 0 : index
    %45 = vector.load %arg3[%44, %c0_8, %c0_9] : memref<2x1x64xf32, #tpu.memory_space<vmem>>, vector<1x1x64xf32>
    %46 = vector.shape_cast %45 : vector<1x1x64xf32> to vector<1x64xf32>
    %47 = vector.shape_cast %43 : vector<1x64xf32> to vector<1x1x64xf32>
    tpu.vector_store %arg3[%44, %c0_8, %c0_9], %47 {strides = array<i32>} : memref<2x1x64xf32, #tpu.memory_space<vmem>>, vector<1x1x64xf32>,
    %c1_i32 = arith.constant 1 : i32
    %48 = arith.index_cast %c1_i32 : i32 to index
    %c0_10 = arith.constant 0 : index
    %c0_11 = arith.constant 0 : index
    %49 = vector.load %arg1[%48, %c0_10, %c0_11] : memref<2x64x256xf32, #tpu.memory_space<vmem>>, vector<1x64x256xf32>
    %50 = vector.shape_cast %49 : vector<1x64x256xf32> to vector<64x256xf32>
    %cst_12 = arith.constant dense<0xFF800000> : vector<64xf32>
    %51 = vector.multi_reduction <maximumf>, %50, %cst_12 [1] : vector<64x256xf32> to vector<64xf32>
    %52 = vector.shape_cast %51 : vector<64xf32> to vector<64x1xf32>
    %53 = vector.shape_cast %52 : vector<64x1xf32> to vector<64x1xf32>
    %54 = vector.broadcast %53 : vector<64x1xf32> to vector<64x64xf32>
    %cst_13 = arith.constant 0xFF800000 : f32
    %55 = vector.broadcast %cst_13 : f32 to vector<64x64xf32>
    %56 = arith.select %2, %54, %55 : vector<64x64xi1>, vector<64x64xf32>
    %cst_14 = arith.constant dense<0xFF800000> : vector<64xf32>
    %57 = vector.multi_reduction <maximumf>, %56, %cst_14 [0] : vector<64x64xf32> to vector<64xf32>
    %58 = vector.shape_cast %57 : vector<64xf32> to vector<1x64xf32>
    %59 = vector.broadcast %58 : vector<1x64xf32> to vector<64x64xf32>
    %60 = vector.broadcast %52 : vector<64x1xf32> to vector<64x64xf32>
    %61 = arith.cmpf ogt, %59, %60 : vector<64x64xf32>
    %62 = vector.broadcast %58 : vector<1x64xf32> to vector<64x64xf32>
    %63 = vector.broadcast %52 : vector<64x1xf32> to vector<64x64xf32>
    %64 = arith.cmpf oeq, %62, %63 : vector<64x64xf32>
    %65 = arith.andi %64, %3 : vector<64x64xi1>
    %66 = arith.ori %61, %65 : vector<64x64xi1>
    %67 = arith.extui %66 : vector<64x64xi1> to vector<64x64xi32>
    %cst_15 = arith.constant dense<0> : vector<64xi32>
    %68 = vector.multi_reduction <add>, %67, %cst_15 [1] : vector<64x64xi32> to vector<64xi32>
    %69 = vector.shape_cast %68 : vector<64xi32> to vector<64x1xi32>
    %c32_i32_16 = arith.constant 32 : i32
    %70 = vector.broadcast %c32_i32_16 : i32 to vector<64x1xi32>
    %71 = arith.cmpi slt, %69, %70 : vector<64x1xi32>
    %72 = arith.extui %71 : vector<64x1xi1> to vector<64x1xi32>
    %73 = arith.sitofp %72 : vector<64x1xi32> to vector<64x1xf32>
    %74 = vector.broadcast %73 : vector<64x1xf32> to vector<64x256xf32>
    %75 = arith.mulf %50, %74 : vector<64x256xf32>
    %76 = arith.index_cast %c1_i32 : i32 to index
    %c0_17 = arith.constant 0 : index
    %c0_18 = arith.constant 0 : index
    %77 = vector.load %arg2[%76, %c0_17, %c0_18] : memref<2x64x256xf32, #tpu.memory_space<vmem>>, vector<1x64x256xf32>
    %78 = vector.shape_cast %77 : vector<1x64x256xf32> to vector<64x256xf32>
    %79 = vector.shape_cast %75 : vector<64x256xf32> to vector<1x64x256xf32>
    tpu.vector_store %arg2[%76, %c0_17, %c0_18], %79 {strides = array<i32>} : memref<2x64x256xf32, #tpu.memory_space<vmem>>, vector<1x64x256xf32>,
    %80 = arith.extui %71 : vector<64x1xi1> to vector<64x1xi32>
    %81 = arith.sitofp %80 : vector<64x1xi32> to vector<64x1xf32>
    %82 = vector.shape_cast %81 : vector<64x1xf32> to vector<64x1xf32>
    %83 = vector.broadcast %82 : vector<64x1xf32> to vector<64x64xf32>
    %cst_19 = arith.constant 0.000000e+00 : f32
    %84 = vector.broadcast %cst_19 : f32 to vector<64x64xf32>
    %85 = arith.select %2, %83, %84 : vector<64x64xi1>, vector<64x64xf32>
    %cst_20 = arith.constant dense<0xFF800000> : vector<64xf32>
    %86 = vector.multi_reduction <maximumf>, %85, %cst_20 [0] : vector<64x64xf32> to vector<64xf32>
    %87 = vector.shape_cast %86 : vector<64xf32> to vector<1x64xf32>
    %88 = arith.index_cast %c1_i32 : i32 to index
    %c0_21 = arith.constant 0 : index
    %c0_22 = arith.constant 0 : index
    %89 = vector.load %arg3[%88, %c0_21, %c0_22] : memref<2x1x64xf32, #tpu.memory_space<vmem>>, vector<1x1x64xf32>
    %90 = vector.shape_cast %89 : vector<1x1x64xf32> to vector<1x64xf32>
    %91 = vector.shape_cast %87 : vector<1x64xf32> to vector<1x1x64xf32>
    tpu.vector_store %arg3[%88, %c0_21, %c0_22], %91 {strides = array<i32>} : memref<2x1x64xf32, #tpu.memory_space<vmem>>, vector<1x1x64xf32>,
    %c2_i32 = arith.constant 2 : i32
    return
  }
  func.func @transform_0(%arg0: i32) -> (i32, i32, i32) {
    %c0_i32 = arith.constant 0 : i32
    %c0_i32_0 = arith.constant 0 : i32
    %c0_i32_1 = arith.constant 0 : i32
    return %arg0, %c0_i32, %c0_i32_0 : i32, i32, i32
  }
  func.func @transform_1(%arg0: i32) -> (i32, i32, i32) {
    %c0_i32 = arith.constant 0 : i32
    %c0_i32_0 = arith.constant 0 : i32
    %c0_i32_1 = arith.constant 0 : i32
    return %arg0, %c0_i32, %c0_i32_0 : i32, i32, i32
  }
  func.func @transform_2(%arg0: i32) -> (i32, i32, i32) {
    %c0_i32 = arith.constant 0 : i32
    %c0_i32_0 = arith.constant 0 : i32
    %c0_i32_1 = arith.constant 0 : i32
    return %arg0, %c0_i32, %c0_i32_0 : i32, i32, i32
  }
}

</mosaic_0001>

<bundles_post_ra>
// kernel: _lambda_.1
= control target key start
LH: loop header
LB: loop body
LE: loop exit
PB: predicated region body
PF: predicated region fallthrough
CT: control target
= control target key end

     0   :  { %8 = vsyncpa [#allocation3], 0  ;;  %s1930_s0 = inlined_call_operand.vmem [shape: f32[4,64,256], index: 0, kind: input, shape index: {}]   ;;  %s1931_s1 = inlined_call_operand.vmem [shape: f32[4,64,256], index: 1, kind: output, shape index: {0}]   ;;  %s1932_s2 = inlined_call_operand.hbm [shape: f32[4,1,64], index: 2, kind: output, shape index: {1}]  }
   0x1   :  { %10 = vsyncpa [#allocation3 + $0x1], 0  ;;  %s1105_s9 = smov 0   ;;  %s1107_s10 = smov 0  }
   0x2   :  { %s1109_s11 = smov 0   ;;  %s1111_s12 = smov 0  }
   0x3 LB: > { %s1126_s13 = sadd.s32 4294967295, %s1083_s12   ;;  %s906_s14 = sadd.s32 4294967294, %s1083_s12   ;;  %s1083_s12 = sphi %s1111_s12, %s1992_s12   ;;  %s1079_s11 = sphi %s1109_s11, %s1991_s11   ;;  %s1075_s10 = sphi %s1107_s10, %s1990_s10   ;;  %s1071_s9 = sphi %s1105_s9, %s1989_s9  }
   0x4   : > { %s1130_s15 = sadd.s32 1, %s1083_s12   ;;  %s75_s16 = sadd.s32 1, %s1079_s11 }
   0x5   : > { %s72_s17 = ssub.s32 %s1083_s12, %s1130_s15  ;;  %p85_p0 = scmp.ne.s32.totalorder %s1079_s11, %s1075_s10 }
   0x6   : > { %p73_p1 = scmp.eq.s32.totalorder %s72_s17, 0  ;;  %p86_p2 = scmp.eq.s32.totalorder %s1126_s13, 1 }
   0x7   : > { %p91_p3 = scmp.ne.s32.totalorder %s1075_s10, %s1071_s9  ;;  %p92_p4 = scmp.eq.s32.totalorder %s906_s14, 1 }
   0x8   : > { %s1141_s18 = scalar_select %p73_p1, %s1079_s11, %s75_s16  }
   0x9   : > { %p1143_p5 = por %p86_p2, %p85_p0  ;;  %p1147_p6 = por %p92_p4, %p91_p3 }
   0xa   : > { %p909_p7 = scmp.ge.s32.totalorder %s1083_s12, 1  ;;  %p120_p8 = scmp.lt.s32.totalorder %s1083_s12, 3 }
   0xc   : > { %p121_p9 = pnand %p909_p7, %p120_p8 }
   0xe   : > { %124 = sbr.rel (%p121_p9) target bundleno = 468 (0x1d4), region = 24 }
  0x15   : > { %s911_s21 = sshll.u32 %s1126_s13, 1  ;;  %v164_v48 = vlaneseq  ;;  %vm239_vm6 = vcmask 523264   ;;  %s146_s29 = sand.u32 1, %s1075_s10  }
  0x16   : > { %p150_p10 = scmp.lt.s32.totalorder %s911_s21, 3  ;;  %s910_s30 = sshll.u32 %s146_s29, 1 }
  0x17   : > { %v1280_v49 = vshrl.u32 %v164_v48, 7  ;;  %v1286_v52 = vand.u32 127, %v164_v48  ;;  %s148_s3 = scalar_lea.vmem [#allocation2], %s910_s30  ;;  %s973_s4 = sshll.u32 %s1126_s13, 5 }
  0x18   : > { %s1994_s21 = smov (!%p150_p10, %s911_s21), 3  ;;  %s818_s5 = sshll.u32 %s148_s3, 4  ;;  %s1884_s5 = int_to_ptr.vmem [resolvable:$true] %s818_s5 }
  0x19   : > { %s971_s22 = sshll.u32 %s1994_s21, 7  ;;  %v1289_v53 = vadd.s32 40, %v1280_v49  ;;  %v1292_v54 = vadd.s32 24, %v1280_v49  ;;  %v1295_v55 = vadd.s32 8, %v1280_v49  ;;  %v1298_v56 = vadd.s32 32, %v1280_v49  ;;  %s1882_s8 = scalar_lea.hbm %s1932_s2, %s973_s4 }
  0x1a   : > { %s1162_s25 = scalar_lea.vmem %s1930_s0, %s971_s22  ;;  %v1303_v58 = vadd.s32 16, %v1280_v49  ;;  %v1308_v60 = vadd.s32 56, %v1280_v49  ;;  %vm1944_vm0 = vcmp.eq.s32.totalorder %v1280_v49, %v1286_v52  ;;  %v1321_v61 = vadd.s32 48, %v1280_v49  ;;  %s1683_s28 = scalar_lea.vmem %s1931_s1, %s971_s22 }
  0x1b   : > { %v1165_v0 = vld [vmem:[%s1162_s25 + $0x20] sm:$0xff]  ;;  %v1168_v1 = vld [vmem:[%s1162_s25 + $0x28] sm:$0xff]  ;;  %v1179_v5 = vld [vmem:[%s1162_s25 + $0x30] sm:$0xff]  ;;  %vm1943_vm1 = vcmp.eq.s32.totalorder %v1289_v53, %v1286_v52  ;;  %vm1942_vm2 = vcmp.eq.s32.totalorder %v1292_v54, %v1286_v52  ;;  %vm1945_vm3 = vcmp.eq.s32.totalorder %v1295_v55, %v1286_v52  ;;  %vm1941_vm4 = vcmp.eq.s32.totalorder %v1298_v56, %v1286_v52  ;;  %s1889_s14 = scalar_lea.sflag [#allocation3], %s146_s29  ;;  %s1021_s16 = scalar_lea.vmem %s1884_s5, 32 }
  0x1c   : > { %v1171_v2 = vld [vmem:[%s1162_s25] sm:$0xff]  ;;  %v213_v3 = vmax.f32 %v1165_v0, %v1168_v1  ;;  %v1176_v4 = vld [vmem:[%s1162_s25 + $0x8] sm:$0xff]  ;;  %v1182_v6 = vld [vmem:[%s1162_s25 + $0x38] sm:$0xff]  ;;  %vm1940_vm5 = vcmp.eq.s32.totalorder %v1303_v58, %v1286_v52  ;;  %vm1939_vm7 = vcmp.eq.s32.totalorder %v1308_v60, %v1286_v52  ;;  %vm1938_vm8 = vcmp.eq.s32.totalorder %v1321_v61, %v1286_v52  ;;  %p1022_p11 = scmp.ne.s32.totalorder %s1884_s5, %s1021_s16  ;;  %s1087_s13 = smov [#allocation2]  }
  0x1d   : > { %v207_v7 = vmax.f32 %v1171_v2, %v1176_v4  ;;  %v1187_v8 = vld [vmem:[%s1162_s25 + $0x10] sm:$0xff]  ;;  %v1190_v9 = vld [vmem:[%s1162_s25 + $0x18] sm:$0xff]  ;;  %v216_v10 = vmax.f32 %v1179_v5, %v1182_v6  ;;  %v1203_v14 = vld [vmem:[%s1162_s25 + $0x40] sm:$0xff]  ;;  %vm189_vm9 = vcmp.lt.s32.totalorder %v1286_v52, %v1321_v61  ;;  %vm184_vm10 = vcmp.lt.s32.totalorder %v1286_v52, %v1295_v55  ;;  %s1025_s17 = sshll.u32 %s1087_s13, 4  ;;  %s1026_s17 = int_to_ptr.vmem [resolvable:$false] %s1025_s17 }
  0x1e   : > { %214 = vmax.xlane.f32.xlu1 %v213_v3  ;;  %v210_v11 = vmax.f32 %v1187_v8, %v1190_v9  ;;  %v1197_v12 = vld [vmem:[%s1162_s25 + $0x50] sm:$0xff]  ;;  %v1200_v13 = vld [vmem:[%s1162_s25 + $0x58] sm:$0xff]  ;;  %v1206_v15 = vld [vmem:[%s1162_s25 + $0x48] sm:$0xff]  ;;  %p1023_p12 = pnand %p1022_p11, %p1143_p5  ;;  %s1027_s21 = scalar_lea.vmem %s1026_s17, 64 }
  0x1f   : > { %208 = vmax.xlane.f32.xlu0 %v207_v7  ;;  %v222_v16 = vmax.f32 %v1197_v12, %v1200_v13  ;;  %v219_v17 = vmax.f32 %v1203_v14, %v1206_v15  ;;  %v1213_v18 = vld [vmem:[%s1162_s25 + $0x70] sm:$0xff]  ;;  %v1216_v19 = vld [vmem:[%s1162_s25 + $0x78] sm:$0xff]  ;;  %v1219_v20 = vld [vmem:[%s1162_s25 + $0x60] sm:$0xff]  ;;  %p1028_p0 = scmp.lt.s32.totalorder %s1884_s5, %s1026_s17  ;;  %p1029_p1 = scmp.lt.s32.totalorder %s1027_s21, %s1021_s16 }
  0x20   : > { %v1222_v21 = vld [vmem:[%s1162_s25 + $0x68] sm:$0xff]  ;;  %v228_v22 = vmax.f32 %v1213_v18, %v1216_v19  ;;  %v1229_v24 = vld [vmem:[%s1162_s25 + $0x90] sm:$0xff]  ;;  %v1232_v25 = vld [vmem:[%s1162_s25 + $0x98] sm:$0xff]  ;;  %p1024_p13 = pneg %p1023_p12 }
  0x21   : > { %v225_v23 = vmax.f32 %v1219_v20, %v1222_v21  ;;  %v1235_v26 = vld [vmem:[%s1162_s25 + $0x80] sm:$0xff]  ;;  %v1238_v27 = vld [vmem:[%s1162_s25 + $0x88] sm:$0xff]  ;;  %v512_v28 = vmax.f32 %v1229_v24, %v1232_v25  ;;  %v1245_v30 = vld [vmem:[%s1162_s25 + $0xb0] sm:$0xff]  ;;  %p1030_p2 = por %p1029_p1, %p1028_p0 }
  0x22   : > { %217 = vmax.xlane.f32.xlu1 %v216_v10  ;;  %v509_v29 = vmax.f32 %v1235_v26, %v1238_v27  ;;  %v1248_v31 = vld [vmem:[%s1162_s25 + $0xb8] sm:$0xff]  ;;  %v1251_v32 = vld [vmem:[%s1162_s25 + $0xa0] sm:$0xff]  ;;  %v1254_v33 = vld [vmem:[%s1162_s25 + $0xa8] sm:$0xff] }
  0x23   : > { %211 = vmax.xlane.f32.xlu0 %v210_v11  ;;  %1952 = vst [vmem:[#allocation5_spill] sm:$0xff] %v1248_v31  ;;  %1953 = vst [vmem:[#allocation6_spill] sm:$0xff] %v1251_v32  ;;  %v518_v34 = vmax.f32 %v1245_v30, %v1248_v31  ;;  %v515_v35 = vmax.f32 %v1251_v32, %v1254_v33  ;;  %v1261_v36 = vld [vmem:[%s1162_s25 + $0xd0] sm:$0xff]  ;;  %v1264_v37 = vld [vmem:[%s1162_s25 + $0xd8] sm:$0xff]  ;;  %p1031_p3 = pnand %p1030_p2, %p1024_p13 }
  0x24   : > { %1954 = vst [vmem:[#allocation7_spill] sm:$0xff] %v1254_v33  ;;  %1955 = vst [vmem:[#allocation8_spill] sm:$0xff] %v1261_v36  ;;  %v1267_v38 = vld [vmem:[%s1162_s25 + $0xc0] sm:$0xff]  ;;  %v1270_v39 = vld [vmem:[%s1162_s25 + $0xc8] sm:$0xff]  ;;  %v524_v40 = vmax.f32 %v1261_v36, %v1264_v37 }
  0x25   : > { %1956 = vst [vmem:[#allocation9_spill] sm:$0xff] %v1264_v37  ;;  %1957 = vst [vmem:[#allocation10_spill] sm:$0xff] %v1267_v38  ;;  %v521_v41 = vmax.f32 %v1267_v38, %v1270_v39  ;;  %v939_v42 = vld [vmem:[%s1162_s25 + $0xf0] sm:$0xff]  ;;  %v940_v43 = vld [vmem:[%s1162_s25 + $0xf8] sm:$0xff] }
  0x26   : > { %223 = vmax.xlane.f32.xlu1 %v222_v16  ;;  %1958 = vst [vmem:[#allocation11_spill] sm:$0xff] %v1270_v39  ;;  %v937_v44 = vld [vmem:[%s1162_s25 + $0xe0] sm:$0xff]  ;;  %v938_v45 = vld [vmem:[%s1162_s25 + $0xe8] sm:$0xff]  ;;  %v530_v46 = vmax.f32 %v939_v42, %v940_v43 }
  0x27   : > { %220 = vmax.xlane.f32.xlu0 %v219_v17  ;;  %v527_v47 = vmax.f32 %v937_v44, %v938_v45 }
  0x2a   : > { %229 = vmax.xlane.f32.xlu1 %v228_v22 }
  0x2b   : > { %226 = vmax.xlane.f32.xlu0 %v225_v23 }
  0x2e   : > { %513 = vmax.xlane.f32.xlu1 %v512_v28 }
  0x2f   : > { %510 = vmax.xlane.f32.xlu0 %v509_v29 }
  0x32   : > { %519 = vmax.xlane.f32.xlu1 %v518_v34 }
  0x33   : > { %516 = vmax.xlane.f32.xlu0 %v515_v35 }
  0x36   : > { %525 = vmax.xlane.f32.xlu1 %v524_v40 }
  0x37   : > { %522 = vmax.xlane.f32.xlu0 %v521_v41 }
  0x3a   : > { %531 = vmax.xlane.f32.xlu1 %v530_v46 }
  0x3b   : > { %528 = vmax.xlane.f32.xlu0 %v527_v47 }
  0xab   : > { %v1282_v50 = vpop.xlane.xlu1 %214 }
  0xac   : > { %v1284_v51 = vpop.xlane.xlu0 %208  ;;  %v233_v23 = vsel %vm1940_vm5, %v1282_v50, -inf }
  0xad   : > { %v231_v7 = vsel %vm1944_vm0, %v1284_v51, -inf  ;;  %v242_v46 = vsel %vm239_vm6, %v233_v23, -inf }
  0xae   : > { %v240_v29 = vsel %vm239_vm6, %v231_v7, -inf }
  0xaf   : > { %v1300_v57 = vpop.xlane.xlu1 %217 }
  0xb0   : > { %v1305_v59 = vpop.xlane.xlu0 %211  ;;  %v234_v10 = vsel %vm1942_vm2, %v1300_v57, -inf }
  0xb1   : > { %v232_v11 = vsel %vm1945_vm3, %v1305_v59, -inf  ;;  %v243_v34 = vsel %vm239_vm6, %v234_v10, -inf }
  0xb2   : > { %v241_v35 = vsel %vm239_vm6, %v232_v11, -inf }
  0xb3   : > { %v1323_v62 = vpop.xlane.xlu1 %223 }
  0xb4   : > { %v236_v63 = vsel %vm1943_vm1, %v1323_v62, -inf  ;;  %v1331_v3 = vpop.xlane.xlu0 %220 }
  0xb5   : > { %v235_v16 = vsel %vm1941_vm4, %v1331_v3, -inf  ;;  %v246_v17 = vsel %vm239_vm6, %v236_v63, -inf }
  0xb6   : > { %v244_v22 = vsel %vm239_vm6, %v235_v16, -inf  ;;  %v247_v42 = vmax.f32 %v241_v35, %v246_v17 }
  0xb7   : > { %v1359_v28 = vpop.xlane.xlu1 %229  ;;  %v245_v43 = vmax.f32 %v240_v29, %v244_v22 }
  0xb8   : > { %v238_v40 = vsel %vm1939_vm7, %v1359_v28, -inf  ;;  %v227_v41 = vpop.xlane.xlu0 %226 }
  0xb9   : > { %v250_v44 = vsel %vm239_vm6, %v238_v40, -inf  ;;  %v237_v45 = vsel %vm1938_vm8, %v227_v41, -inf  ;;  %v252_v11 = vmax.f32 %v245_v43, %v247_v42 }
  0xba   : > { %v251_v47 = vmax.f32 %v243_v34, %v250_v44  ;;  %v248_v48 = vsel %vm239_vm6, %v237_v45, -inf }
  0xbb   : > { %v249_v63 = vmax.f32 %v242_v46, %v248_v48  ;;  %v1374_v7 = vpop.xlane.xlu1 %513 }
  0xbc   : > { %v1376_v10 = vpop.xlane.xlu0 %510  ;;  %v534_v23 = vsel %vm1945_vm3, %v1374_v7, -inf }
  0xbd   : > { %v253_v16 = vmax.f32 %v249_v63, %v251_v47  ;;  %v533_v34 = vsel %vm1944_vm0, %v1376_v10, -inf }
  0xbf   : > { %v254_v17 = vmax.f32 %v252_v11, %v253_v16  ;;  %v1378_v22 = vpop.xlane.xlu1 %519  ;;  %v542_v11 = vsel %vm239_vm6, %v534_v23, -inf }
  0xc0   : > { %v1380_v29 = vpop.xlane.xlu0 %516  ;;  %v536_v45 = vsel %vm1942_vm2, %v1378_v22, -inf }
  0xc1   : > { %v255_v35 = vrot.slane %v254_v17, 4  ;;  %v535_v16 = vsel %vm1940_vm5, %v1380_v29, -inf }
  0xc3   : > { %v256_v40 = vmax.f32 %v254_v17, %v255_v35  ;;  %v1382_v39 = vpop.xlane.xlu1 %525  ;;  %v541_v35 = vsel %vm239_vm6, %v533_v34, -inf  ;;  %v543_v34 = vsel %vm239_vm6, %v535_v16, -inf }
  0xc4   : > { %v538_v42 = vsel %vm1943_vm1, %v1382_v39, -inf  ;;  %v1396_v43 = vpop.xlane.xlu0 %522 }
  0xc5   : > { %v257_v44 = vrot.slane %v256_v40, 2  ;;  %v547_v46 = vsel %vm239_vm6, %v538_v42, -inf  ;;  %v537_v47 = vsel %vm1941_vm4, %v1396_v43, -inf  ;;  %v544_v42 = vsel %vm239_vm6, %v536_v45, -inf }
  0xc6   : > { %v545_v48 = vsel %vm239_vm6, %v537_v47, -inf  ;;  %v548_v38 = vmax.f32 %v542_v11, %v547_v46 }
  0xc7   : > { %v258_v63 = vmax.f32 %v256_v40, %v257_v44  ;;  %v1413_v17 = vpop.xlane.xlu1 %531  ;;  %v546_v44 = vmax.f32 %v541_v35, %v545_v48 }
  0xc8   : > { %v540_v47 = vsel %vm1939_vm7, %v1413_v17, -inf  ;;  %v1421_v40 = vpop.xlane.xlu0 %528  ;;  %vm1947_vm7 = vcmp.lt.s32.totalorder %v1286_v52, %v1280_v49 }
  0xc9   : > { %v259_v23 = vrot.slane %v258_v63, 1  ;;  %v551_v37 = vsel %vm239_vm6, %v540_v47, -inf  ;;  %v539_v36 = vsel %vm1938_vm8, %v1421_v40, -inf  ;;  %v553_v48 = vmax.f32 %v546_v44, %v548_v38 }
  0xca   : > { %v552_v45 = vmax.f32 %v544_v42, %v551_v37  ;;  %v549_v46 = vsel %vm239_vm6, %v539_v36, -inf  ;;  %v1085_v38 = vmov 0  }
  0xcb   : > { %v1432_v11 = vmax.f32 %v258_v63, %v259_v23  ;;  %v550_v33 = vmax.f32 %v543_v34, %v549_v46 }
  0xcd   : > { %vm267_vm11 = vcmp.gt.f32.partialorder %v1432_v11, %v227_v41  ;;  %vm275_vm12 = vcmp.eq.f32.partialorder %v1432_v11, %v227_v41  ;;  %v554_v35 = vmax.f32 %v550_v33, %v552_v45  ;;  %vm262_vm14 = vcmp.gt.f32.partialorder %v1432_v11, %v1305_v59 }
  0xce   : > { %vm283_vm13 = vmand %vm275_vm12, %vm189_vm9  ;;  %vm270_vm15 = vcmp.eq.f32.partialorder %v1432_v11, %v1305_v59  ;;  %vm269_vm5 = vcmp.eq.f32.partialorder %v1432_v11, %v1284_v51  ;;  %vm261_vm4 = vcmp.gt.f32.partialorder %v1432_v11, %v1284_v51  ;;  %vm271_vm0 = vcmp.eq.f32.partialorder %v1432_v11, %v1282_v50 }
  0xcf   : > { %vm1445_vm8 = vmor %vm267_vm11, %vm283_vm13  ;;  %v555_v37 = vmax.f32 %v553_v48, %v554_v35  ;;  %vm1946_vm11 = vcmp.lt.s32.totalorder %v1286_v52, %v1292_v54  ;;  %vm272_vm13 = vcmp.eq.f32.partialorder %v1432_v11, %v1300_v57  ;;  %vm274_vm3 = vcmp.eq.f32.partialorder %v1432_v11, %v1323_v62 }
  0xd0   : > { %vm278_vm12 = vmand %vm270_vm15, %vm184_vm10  ;;  %vm264_vm15 = vcmp.gt.f32.partialorder %v1432_v11, %v1300_v57 }
  0xd1   : > { %v556_v33 = vrot.slane %v555_v37, 4  ;;  %vm286_vm2 = vmor %vm262_vm14, %vm278_vm12  ;;  %vm185_vm12 = vcmp.lt.s32.totalorder %v1286_v52, %v1303_v58 }
  0xd2   : > { %v294_v59 = vsel %vm286_vm2, 1, %v1085_v38  ;;  %vm277_vm1 = vmand %vm269_vm5, %vm1947_vm7  ;;  %vm263_vm5 = vcmp.gt.f32.partialorder %v1432_v11, %v1282_v50  ;;  %vm190_vm7 = vcmp.lt.s32.totalorder %v1286_v52, %v1308_v60 }
  0xd3   : > { %v557_v41 = vmax.f32 %v555_v37, %v556_v33  ;;  %v1469_v51 = vsel %vm239_vm6, %v294_v59, 0  ;;  %vm285_vm14 = vmor %vm261_vm4, %vm277_vm1  ;;  %vm188_vm1 = vcmp.lt.s32.totalorder %v1286_v52, %v1289_v53  ;;  %v299_v33 = vsel %vm1445_vm8, 1, %v1085_v38 }
  0xd4   : > { %v316_v63 = vshrl.u32 %v1469_v51, 16  ;;  %v293_v16 = vsel %vm285_vm14, 1, %v1085_v38  ;;  %vm280_vm2 = vmand %vm272_vm13, %vm1946_vm11  ;;  %vm187_vm14 = vcmp.lt.s32.totalorder %v1286_v52, %v1298_v56  ;;  %vm266_vm11 = vcmp.gt.f32.partialorder %v1432_v11, %v1323_v62 }
  0xd5   : > { %v558_v57 = vrot.slane %v557_v41, 2  ;;  %v1485_v42 = vsel %vm239_vm6, %v293_v16, 0  ;;  %vm288_vm4 = vmor %vm264_vm15, %vm280_vm2  ;;  %vm273_vm2 = vcmp.eq.f32.partialorder %v1432_v11, %v1331_v3 }
  0xd6   : > { %v318_v47 = vcvt.s32.f32 %v316_v63  ;;  %v303_v23 = vshrl.u32 %v1485_v42, 16  ;;  %v296_v44 = vsel %vm288_vm4, 1, %v1085_v38  ;;  %vm279_vm13 = vmand %vm271_vm0, %vm185_vm12 }
  0xd7   : > { %v559_v50 = vmax.f32 %v557_v41, %v558_v57  ;;  %v1499_v34 = vsel %vm239_vm6, %v296_v44, 0  ;;  %vm287_vm15 = vmor %vm263_vm5, %vm279_vm13  ;;  %vm265_vm5 = vcmp.gt.f32.partialorder %v1432_v11, %v1331_v3  ;;  %vm276_vm13 = vcmp.eq.f32.partialorder %v1432_v11, %v1359_v28 }
  0xd8   : > { %321 = vadd.xlane.f32.xlu1 %v318_v47  ;;  %v305_v45 = vcvt.s32.f32 %v303_v23  ;;  %v342_v46 = vshrl.u32 %v1499_v34, 16  ;;  %v295_v48 = vsel %vm287_vm15, 1, %v1085_v38  ;;  %vm282_vm0 = vmand %vm274_vm3, %vm188_vm1  ;;  %v1547_v3 = vsel %vm239_vm6, %v299_v33, 0 }
  0xd9   : > { %v560_v35 = vrot.slane %v559_v50, 1  ;;  %v1516_v37 = vsel %vm239_vm6, %v295_v48, 0  ;;  %vm290_vm4 = vmor %vm266_vm11, %vm282_vm0  ;;  %vm268_vm11 = vcmp.gt.f32.partialorder %v1432_v11, %v1359_v28  ;;  %v381_v48 = vshrl.u32 %v1547_v3, 16 }
  0xda   : > { %308 = vadd.xlane.f32.xlu0 %v305_v45  ;;  %v344_v59 = vcvt.s32.f32 %v342_v46  ;;  %v329_v62 = vshrl.u32 %v1516_v37, 16  ;;  %v298_v41 = vsel %vm290_vm4, 1, %v1085_v38  ;;  %vm281_vm3 = vmand %vm273_vm2, %vm187_vm14 }
  0xdb   : > { %v1533_v63 = vmax.f32 %v559_v50, %v560_v35  ;;  %v1536_v36 = vsel %vm239_vm6, %v298_v41, 0  ;;  %vm289_vm8 = vmor %vm265_vm5, %vm281_vm3 }
  0xdc   : > { %347 = vadd.xlane.f32.xlu1 %v344_v59  ;;  %v331_v16 = vcvt.s32.f32 %v329_v62  ;;  %v368_v57 = vshrl.u32 %v1536_v36, 16  ;;  %v297_v47 = vsel %vm289_vm8, 1, %v1085_v38  ;;  %vm284_vm15 = vmand %vm276_vm13, %vm190_vm7 }
  0xdd   : > { %vm568_vm2 = vcmp.gt.f32.partialorder %v1533_v63, %v1421_v40  ;;  %vm576_vm0 = vcmp.eq.f32.partialorder %v1533_v63, %v1421_v40  ;;  %v1554_v23 = vsel %vm239_vm6, %v297_v47, 0  ;;  %vm292_vm5 = vmor %vm268_vm11, %vm284_vm15  ;;  %vm563_vm4 = vcmp.gt.f32.partialorder %v1533_v63, %v1374_v7 }
  0xde   : > { %vm584_vm13 = vmand %vm576_vm0, %vm189_vm9  ;;  %334 = vadd.xlane.f32.xlu0 %v331_v16  ;;  %v370_v28 = vcvt.s32.f32 %v368_v57  ;;  %v355_v11 = vshrl.u32 %v1554_v23, 16  ;;  %v300_v44 = vsel %vm292_vm5, 1, %v1085_v38  ;;  %vm571_vm3 = vcmp.eq.f32.partialorder %v1533_v63, %v1374_v7 }
  0xdf   : > { %vm1565_vm8 = vmor %vm568_vm2, %vm584_vm13  ;;  %v1570_v50 = vsel %vm239_vm6, %v300_v44, 0  ;;  %vm570_vm11 = vcmp.eq.f32.partialorder %v1533_v63, %v1376_v10  ;;  %vm562_vm15 = vcmp.gt.f32.partialorder %v1533_v63, %v1376_v10  ;;  %vm573_vm0 = vcmp.eq.f32.partialorder %v1533_v63, %v1378_v22 }
  0xe0   : > { %373 = vadd.xlane.f32.xlu1 %v370_v28  ;;  %v357_v45 = vcvt.s32.f32 %v355_v11  ;;  %v394_v46 = vshrl.u32 %v1570_v50, 16  ;;  %vm579_vm9 = vmand %vm571_vm3, %vm184_vm10  ;;  %vm1963_vm5 = vcmp.lt.s32.totalorder %v1286_v52, %v1280_v49  ;;  %vm565_vm10 = vcmp.gt.f32.partialorder %v1533_v63, %v1378_v22 }
  0xe1   : > { %vm587_vm2 = vmor %vm563_vm4, %vm579_vm9  ;;  %vm572_vm4 = vcmp.eq.f32.partialorder %v1533_v63, %v1380_v29  ;;  %v383_v7 = vcvt.s32.f32 %v381_v48  ;;  %vm1964_vm9 = vcmp.lt.s32.totalorder %v1286_v52, %v1292_v54  ;;  %v600_v48 = vsel %vm1565_vm8, 1, %v1085_v38 }
  0xe2   : > { %360 = vadd.xlane.f32.xlu0 %v357_v45  ;;  %v396_v35 = vcvt.s32.f32 %v394_v46  ;;  %v595_v33 = vsel %vm587_vm2, 1, %v1085_v38  ;;  %vm578_vm13 = vmand %vm570_vm11, %vm1963_vm5  ;;  %vm564_vm2 = vcmp.gt.f32.partialorder %v1533_v63, %v1380_v29  ;;  %vm575_vm5 = vcmp.eq.f32.partialorder %v1533_v63, %v1382_v39 }
  0xe3   : > { %v1593_v10 = vsel %vm239_vm6, %v595_v33, 0  ;;  %vm586_vm3 = vmor %vm562_vm15, %vm578_vm13  ;;  %vm567_vm13 = vcmp.gt.f32.partialorder %v1533_v63, %v1382_v39 }
  0xe4   : > { %399 = vadd.xlane.f32.xlu1 %v396_v35  ;;  %v617_v59 = vshrl.u32 %v1593_v10, 16  ;;  %v594_v62 = vsel %vm586_vm3, 1, %v1085_v38  ;;  %vm581_vm11 = vmand %vm573_vm0, %vm1964_vm9  ;;  %vm574_vm3 = vcmp.eq.f32.partialorder %v1533_v63, %v1396_v43 }
  0xe5   : > { %v1605_v22 = vsel %vm239_vm6, %v594_v62, 0  ;;  %vm589_vm15 = vmor %vm565_vm10, %vm581_vm11  ;;  %vm569_vm11 = vcmp.gt.f32.partialorder %v1533_v63, %v1413_v17 }
  0xe6   : > { %386 = vadd.xlane.f32.xlu0 %v383_v7  ;;  %v619_v41 = vcvt.s32.f32 %v617_v59  ;;  %v604_v16 = vshrl.u32 %v1605_v22, 16  ;;  %v597_v57 = vsel %vm589_vm15, 1, %v1085_v38  ;;  %vm580_vm0 = vmand %vm572_vm4, %vm185_vm12  ;;  %vm566_vm4 = vcmp.gt.f32.partialorder %v1533_v63, %v1396_v43 }
  0xe7   : > { %v1617_v29 = vsel %vm239_vm6, %v597_v57, 0  ;;  %vm588_vm10 = vmor %vm564_vm2, %vm580_vm0  ;;  %vm577_vm2 = vcmp.eq.f32.partialorder %v1533_v63, %v1413_v17  ;;  %v680_v43 = vsel %vm239_vm6, %v600_v48, 0  ;;  %v302_v63 = vand.u32 65535, %v1485_v42 }
  0xe8   : > { %622 = vadd.xlane.f32.xlu1 %v619_v41  ;;  %v606_v47 = vcvt.s32.f32 %v604_v16  ;;  %v643_v28 = vshrl.u32 %v1617_v29, 16  ;;  %v596_v11 = vsel %vm588_vm10, 1, %v1085_v38  ;;  %vm583_vm12 = vmand %vm575_vm5, %vm188_vm1  ;;  %v341_v48 = vand.u32 65535, %v1499_v34 }
  0xe9   : > { %v1629_v39 = vsel %vm239_vm6, %v596_v11, 0  ;;  %vm591_vm9 = vmor %vm567_vm13, %vm583_vm12  ;;  %v682_v11 = vshrl.u32 %v680_v43, 16  ;;  %v393_v42 = vand.u32 65535, %v1570_v50  ;;  %v380_v34 = vand.u32 65535, %v1547_v3 }
  0xea   : > { %609 = vadd.xlane.f32.xlu0 %v606_v47  ;;  %v645_v44 = vcvt.s32.f32 %v643_v28  ;;  %v630_v45 = vshrl.u32 %v1629_v39, 16  ;;  %v599_v46 = vsel %vm591_vm9, 1, %v1085_v38  ;;  %vm582_vm1 = vmand %vm574_vm3, %vm187_vm14  ;;  %v629_v50 = vand.u32 65535, %v1629_v39 }
  0xeb   : > { %v667_v35 = vsel %vm239_vm6, %v599_v46, 0  ;;  %vm590_vm15 = vmor %vm566_vm4, %vm582_vm1  ;;  %v684_v17 = vcvt.s32.f32 %v682_v11  ;;  %vm1966_vm13 = vcmp.eq.s32.totalorder %v1295_v55, %v1286_v52  ;;  %vm1967_vm3 = vcmp.eq.s32.totalorder %v1280_v49, %v1286_v52 }
  0xec   : > { %648 = vadd.xlane.f32.xlu1 %v645_v44  ;;  %v632_v33 = vcvt.s32.f32 %v630_v45  ;;  %v669_v7 = vshrl.u32 %v667_v35, 16  ;;  %v598_v59 = vsel %vm590_vm15, 1, %v1085_v38  ;;  %vm585_vm5 = vmand %vm577_vm2, %vm190_vm7  ;;  %v315_v45 = vand.u32 65535, %v1469_v51 }
  0xed   : > { %v654_v62 = vsel %vm239_vm6, %v598_v59, 0  ;;  %vm593_vm14 = vmor %vm569_vm11, %vm585_vm5  ;;  %v367_v59 = vand.u32 65535, %v1536_v36  ;;  %v354_v51 = vand.u32 65535, %v1554_v23  ;;  %v603_v36 = vand.u32 65535, %v1605_v22 }
  0xee   : > { %635 = vadd.xlane.f32.xlu0 %v632_v33  ;;  %v671_v40 = vcvt.s32.f32 %v669_v7  ;;  %v656_v41 = vshrl.u32 %v654_v62, 16  ;;  %v601_v16 = vsel %vm593_vm14, 1, %v1085_v38  ;;  %v317_v46 = vcvt.s32.f32 %v315_v45 }
  0xef   : > { %v693_v57 = vsel %vm239_vm6, %v601_v16, 0  ;;  %v304_v38 = vcvt.s32.f32 %v302_v63  ;;  %v328_v33 = vand.u32 65535, %v1516_v37  ;;  %v343_v7 = vcvt.s32.f32 %v341_v48 }
  0xf0   : > { %674 = vadd.xlane.f32.xlu1 %v671_v40  ;;  %v658_v47 = vcvt.s32.f32 %v656_v41  ;;  %v695_v28 = vshrl.u32 %v693_v57, 16  ;;  %v369_v41 = vcvt.s32.f32 %v367_v59  ;;  %v356_v16 = vcvt.s32.f32 %v354_v51 }
  0xf1   : > { %v330_v40 = vcvt.s32.f32 %v328_v33  ;;  %v616_v37 = vand.u32 65535, %v1593_v10  ;;  %v642_v23 = vand.u32 65535, %v1617_v29  ;;  %v631_v3 = vcvt.s32.f32 %v629_v50 }
  0xf2   : > { %661 = vadd.xlane.f32.xlu0 %v658_v47  ;;  %v697_v44 = vcvt.s32.f32 %v695_v28  ;;  %v395_v47 = vcvt.s32.f32 %v393_v42  ;;  %v382_v28 = vcvt.s32.f32 %v380_v34  ;;  %v655_v63 = vand.u32 65535, %v654_v62 }
  0xf3   : > { %v618_v11 = vcvt.s32.f32 %v616_v37  ;;  %v644_v45 = vcvt.s32.f32 %v642_v23  ;;  %v681_v22 = vand.u32 65535, %v680_v43  ;;  %vm1968_vm4 = vcmp.eq.s32.totalorder %v1289_v53, %v1286_v52 }
  0xf4   : > { %700 = vadd.xlane.f32.xlu1 %v697_v44  ;;  %v605_v44 = vcvt.s32.f32 %v603_v36  ;;  %v657_v48 = vcvt.s32.f32 %v655_v63  ;;  %vm1969_vm11 = vcmp.eq.s32.totalorder %v1292_v54, %v1286_v52  ;;  %vm1970_vm2 = vcmp.eq.s32.totalorder %v1298_v56, %v1286_v52 }
  0xf5   : > { %v683_v29 = vcvt.s32.f32 %v681_v22  ;;  %vm1971_vm1 = vcmp.eq.s32.totalorder %v1303_v58, %v1286_v52 }
  0xf6   : > { %687 = vadd.xlane.f32.xlu0 %v684_v17  ;;  %v668_v17 = vand.u32 65535, %v667_v35 }
  0xf8   : > { %319 = vadd.xlane.f32.xlu1 %v317_v46  ;;  %v670_v10 = vcvt.s32.f32 %v668_v17  ;;  %v694_v46 = vand.u32 65535, %v693_v57 }
  0xfa   : > { %306 = vadd.xlane.f32.xlu0 %v304_v38  ;;  %v696_v38 = vcvt.s32.f32 %v694_v46 }
  0xfc   : > { %345 = vadd.xlane.f32.xlu1 %v343_v7 }
  0xfe   : > { %332 = vadd.xlane.f32.xlu0 %v330_v40 }
 0x100   : > { %371 = vadd.xlane.f32.xlu1 %v369_v41 }
 0x102   : > { %358 = vadd.xlane.f32.xlu0 %v356_v16 }
 0x104   : > { %397 = vadd.xlane.f32.xlu1 %v395_v47 }
 0x106   : > { %384 = vadd.xlane.f32.xlu0 %v382_v28 }
 0x108   : > { %620 = vadd.xlane.f32.xlu1 %v618_v11 }
 0x10a   : > { %607 = vadd.xlane.f32.xlu0 %v605_v44 }
 0x10c   : > { %646 = vadd.xlane.f32.xlu1 %v644_v45 }
 0x10e   : > { %633 = vadd.xlane.f32.xlu0 %v631_v3 }
 0x110   : > { %672 = vadd.xlane.f32.xlu1 %v670_v10 }
 0x112   : > { %659 = vadd.xlane.f32.xlu0 %v657_v48 }
 0x114   : > { %698 = vadd.xlane.f32.xlu1 %v696_v38 }
 0x116   : > { %685 = vadd.xlane.f32.xlu0 %v683_v29 }
 0x165   : > { %v322_v33 = vpop.xlane.xlu1 %321 }
 0x166   : > { %v324_v37 = vcvt.f32.s32 %v322_v33 }
 0x167   : > { %v309_v7 = vpop.xlane.xlu0 %308 }
 0x168   : > { %v311_v28 = vcvt.f32.s32 %v309_v7  ;;  %v325_v17 = vshll.u32 %v324_v37, 16  ;;  %v1086_v37 = vmov 0.0  }
 0x169   : > { %v348_v39 = vpop.xlane.xlu1 %347 }
 0x16a   : > { %v350_v11 = vcvt.f32.s32 %v348_v39  ;;  %v312_v63 = vshll.u32 %v311_v28, 16 }
 0x16b   : > { %v335_v59 = vpop.xlane.xlu0 %334 }
 0x16c   : > { %v337_v23 = vcvt.f32.s32 %v335_v59  ;;  %v351_v22 = vshll.u32 %v350_v11, 16 }
 0x16d   : > { %v374_v40 = vpop.xlane.xlu1 %373 }
 0x16e   : > { %v376_v44 = vcvt.f32.s32 %v374_v40  ;;  %v338_v33 = vshll.u32 %v337_v23, 16 }
 0x16f   : > { %v361_v35 = vpop.xlane.xlu0 %360 }
 0x170   : > { %v363_v50 = vcvt.f32.s32 %v361_v35  ;;  %v377_v7 = vshll.u32 %v376_v44, 16 }
 0x171   : > { %v400_v51 = vpop.xlane.xlu1 %399 }
 0x172   : > { %v402_v10 = vcvt.f32.s32 %v400_v51  ;;  %v364_v31 = vshll.u32 %v363_v50, 16 }
 0x173   : > { %v387_v41 = vpop.xlane.xlu0 %386 }
 0x174   : > { %v389_v46 = vcvt.f32.s32 %v387_v41  ;;  %v1685_v51 = vshll.u32 %v402_v10, 16 }
 0x175   : > { %v623_v62 = vpop.xlane.xlu1 %622 }
 0x176   : > { %v625_v38 = vcvt.f32.s32 %v623_v62  ;;  %v1687_v41 = vshll.u32 %v389_v46, 16 }
 0x177   : > { %v610_v42 = vpop.xlane.xlu0 %609 }
 0x178   : > { %v1690_v28 = vshll.u32 %v625_v38, 16 }
 0x179   : > { %v649_v16 = vpop.xlane.xlu1 %648 }
 0x17a   : > { %v651_v59 = vcvt.f32.s32 %v649_v16 }
 0x17b   : > { %v636_v57 = vpop.xlane.xlu0 %635 }
 0x17c   : > { %v638_v62 = vcvt.f32.s32 %v636_v57 }
 0x17d   : > { %v1670_v34 = vpop.xlane.xlu1 %674 }
 0x17f   : > { %v1672_v43 = vpop.xlane.xlu0 %661 }
 0x181   : > { %v1674_v47 = vpop.xlane.xlu1 %700 }
 0x183   : > { %v1676_v36 = vpop.xlane.xlu0 %687 }
 0x184   : > { %1965 = vst [vmem:[#allocation12_spill] sm:$0xff] %v1676_v36  ;;  %v612_v36 = vcvt.f32.s32 %v610_v42 }
 0x185   : > { %v320_v45 = vpop.xlane.xlu1 %319 }
 0x186   : > { %v323_v3 = vcvt.f32.s32 %v320_v45  ;;  %v1694_v23 = vshll.u32 %v612_v36, 16  ;;  %v677_v36 = vcvt.f32.s32 %v1670_v34 }
 0x187   : > { %v307_v48 = vpop.xlane.xlu0 %306 }
 0x188   : > { %v326_v29 = vadd.s32 %v325_v17, %v323_v3  ;;  %v310_v32 = vcvt.f32.s32 %v307_v48  ;;  %v1697_v17 = vshll.u32 %v651_v59, 16  ;;  %v664_v48 = vcvt.f32.s32 %v1672_v43 }
 0x189   : > { %v346_v39 = vpop.xlane.xlu1 %345 }
 0x18a   : > { %vm406_vm7 = vcmp.lt.s32.totalorder %v326_v29, 32  ;;  %v313_v40 = vadd.s32 %v312_v63, %v310_v32  ;;  %v349_v35 = vcvt.f32.s32 %v346_v39 }
 0x18b   : > { %v918_v42 = vsel %vm406_vm7, 1.0, %v1086_v37  ;;  %v333_v16 = vpop.xlane.xlu0 %332  ;;  %vm1972_vm7 = vcmp.eq.s32.totalorder %v1308_v60, %v1286_v52 }
 0x18c   : > { %v431_v32 = vmul.f32 %v918_v42, %v1187_v8  ;;  %v432_v11 = vmul.f32 %v918_v42, %v1190_v9  ;;  %vm405_vm8 = vcmp.lt.s32.totalorder %v313_v40, 32  ;;  %v352_v50 = vadd.s32 %v351_v22, %v349_v35 }
 0x18d   : > { %v917_v44 = vsel %vm405_vm8, 1.0, %v1086_v37  ;;  %v336_v45 = vcvt.f32.s32 %v333_v16  ;;  %v372_v57 = vpop.xlane.xlu1 %371  ;;  %v1703_v9 = vshll.u32 %v638_v62, 16  ;;  %v703_v35 = vcvt.f32.s32 %v1674_v47 }
 0x18e   : > { %447 = vst [vmem:[%s1683_s28 + $0x10] sm:$0xff] %v431_v32  ;;  %448 = vst [vmem:[%s1683_s28 + $0x18] sm:$0xff] %v432_v11  ;;  %v429_v3 = vmul.f32 %v917_v44, %v1171_v2  ;;  %v430_v8 = vmul.f32 %v917_v44, %v1176_v4  ;;  %v375_v63 = vcvt.f32.s32 %v372_v57  ;;  %vm408_vm0 = vcmp.lt.s32.totalorder %v352_v50, 32 }
 0x18f   : > { %v339_v10 = vadd.s32 %v338_v33, %v336_v45  ;;  %v359_v46 = vpop.xlane.xlu0 %358  ;;  %v920_v22 = vsel %vm408_vm0, 1.0, %v1086_v37  ;;  %v462_v4 = vsel %vm1966_vm13, %v918_v42, 0.0  ;;  %v461_v59 = vsel %vm1967_vm3, %v917_v44, 0.0 }
 0x190   : > { %445 = vst [vmem:[%s1683_s28] sm:$0xff] %v429_v3  ;;  %446 = vst [vmem:[%s1683_s28 + $0x8] sm:$0xff] %v430_v8  ;;  %v378_v38 = vadd.s32 %v377_v7, %v375_v63  ;;  %v362_v2 = vcvt.f32.s32 %v359_v46  ;;  %v435_v29 = vmul.f32 %v920_v22, %v1179_v5  ;;  %v436_v39 = vmul.f32 %v920_v22, %v1182_v6 }
 0x191   : > { %vm407_vm10 = vcmp.lt.s32.totalorder %v339_v10, 32  ;;  %v398_v33 = vpop.xlane.xlu1 %397  ;;  %v1726_v16 = vsel %vm239_vm6, %v462_v4, -inf  ;;  %v464_v45 = vsel %vm1969_vm11, %v920_v22, 0.0  ;;  %vm1973_vm0 = vcmp.eq.s32.totalorder %v1321_v61, %v1286_v52  ;;  %vm1983_vm11 = vmmov %vm1970_vm2 }
 0x192   : > { %v919_v40 = vsel %vm407_vm10, 1.0, %v1086_v37  ;;  %vm410_vm12 = vcmp.lt.s32.totalorder %v378_v38, 32  ;;  %v365_v7 = vadd.s32 %v364_v31, %v362_v2  ;;  %451 = vst [vmem:[%s1683_s28 + $0x30] sm:$0xff] %v435_v29  ;;  %452 = vst [vmem:[%s1683_s28 + $0x38] sm:$0xff] %v436_v39  ;;  %v472_v29 = vsel %vm239_vm6, %v464_v45, -inf }
 0x193   : > { %v433_v5 = vmul.f32 %v919_v40, %v1165_v0  ;;  %v434_v6 = vmul.f32 %v919_v40, %v1168_v1  ;;  %v922_v62 = vsel %vm410_vm12, 1.0, %v1086_v37  ;;  %v385_v42 = vpop.xlane.xlu0 %384  ;;  %v1734_v0 = vsel %vm239_vm6, %v461_v59, -inf }
 0x194   : > { %v439_v32 = vmul.f32 %v922_v62, %v1197_v12  ;;  %v440_v31 = vmul.f32 %v922_v62, %v1200_v13  ;;  %v466_v11 = vsel %vm1968_vm4, %v922_v62, 0.0  ;;  %vm409_vm9 = vcmp.lt.s32.totalorder %v365_v7, 32 }
 0x195   : > { %449 = vst [vmem:[%s1683_s28 + $0x20] sm:$0xff] %v433_v5  ;;  %450 = vst [vmem:[%s1683_s28 + $0x28] sm:$0xff] %v434_v6  ;;  %v401_v1 = vcvt.f32.s32 %v398_v33  ;;  %v388_v44 = vcvt.f32.s32 %v385_v42  ;;  %v621_v50 = vpop.xlane.xlu1 %620  ;;  %v475_v12 = vsel %vm239_vm6, %v466_v11, -inf  ;;  %v921_v13 = vsel %vm409_vm9, 1.0, %v1086_v37 }
 0x196   : > { %455 = vst [vmem:[%s1683_s28 + $0x50] sm:$0xff] %v439_v32  ;;  %456 = vst [vmem:[%s1683_s28 + $0x58] sm:$0xff] %v440_v31  ;;  %v624_v57 = vcvt.f32.s32 %v621_v50  ;;  %v437_v3 = vmul.f32 %v921_v13, %v1203_v14  ;;  %v438_v8 = vmul.f32 %v921_v13, %v1206_v15  ;;  %v465_v63 = vsel %vm1970_vm2, %v921_v13, 0.0 }
 0x197   : > { %v404_v10 = vadd.s32 %v1685_v51, %v401_v1  ;;  %v608_v46 = vpop.xlane.xlu0 %607  ;;  %v473_v22 = vsel %vm239_vm6, %v465_v63, -inf  ;;  %v391_v38 = vadd.s32 %v1687_v41, %v388_v44  ;;  %v463_v14 = vsel %vm1971_vm1, %v919_v40, 0.0  ;;  %vm1984_vm2 = vmmov %vm1972_vm7 }
 0x198   : > { %v627_v2 = vadd.s32 %v1690_v28, %v624_v57  ;;  %v611_v4 = vcvt.f32.s32 %v608_v46  ;;  %v476_v15 = vmax.f32 %v1726_v16, %v475_v12  ;;  %453 = vst [vmem:[%s1683_s28 + $0x40] sm:$0xff] %v437_v3  ;;  %454 = vst [vmem:[%s1683_s28 + $0x48] sm:$0xff] %v438_v8  ;;  %v474_v28 = vmax.f32 %v1734_v0, %v473_v22 }
 0x199   : > { %vm412_vm15 = vcmp.lt.s32.totalorder %v404_v10, 32  ;;  %v647_v51 = vpop.xlane.xlu1 %646  ;;  %vm411_vm5 = vcmp.lt.s32.totalorder %v391_v38, 32  ;;  %v471_v32 = vsel %vm239_vm6, %v463_v14, -inf  ;;  %v704_v8 = vshll.u32 %v703_v35, 16  ;;  %v1974_v35 = vld [vmem:[#allocation5_spill] sm:$0xff]  ;;  %v1976_v14 = vld [vmem:[#allocation7_spill] sm:$0xff] }
 0x19a   : > { %v924_v39 = vsel %vm412_vm15, 1.0, %v1086_v37  ;;  %vm707_vm14 = vcmp.lt.s32.totalorder %v627_v2, 32  ;;  %v614_v41 = vadd.s32 %v1694_v23, %v611_v4  ;;  %v923_v6 = vsel %vm411_vm5, 1.0, %v1086_v37  ;;  %v1975_v4 = vld [vmem:[#allocation6_spill] sm:$0xff] }
 0x19b   : > { %v443_v33 = vmul.f32 %v924_v39, %v1213_v18  ;;  %v444_v59 = vmul.f32 %v924_v39, %v1216_v19  ;;  %v468_v40 = vsel %vm1972_vm7, %v924_v39, 0.0  ;;  %v634_v7 = vpop.xlane.xlu0 %633  ;;  %v1772_v62 = vsel %vm707_vm14, 1.0, %v1086_v37  ;;  %v1977_v39 = vld [vmem:[#allocation12_spill] sm:$0xff] }
 0x19c   : > { %v479_v5 = vsel %vm239_vm6, %v468_v40, -inf  ;;  %vm706_vm8 = vcmp.lt.s32.totalorder %v614_v41, 32  ;;  %v441_v19 = vmul.f32 %v923_v6, %v1219_v20  ;;  %v442_v23 = vmul.f32 %v923_v6, %v1222_v21  ;;  %v1979_v40 = vld [vmem:[#allocation9_spill] sm:$0xff] }
 0x19d   : > { %459 = vst [vmem:[%s1683_s28 + $0x70] sm:$0xff] %v443_v33  ;;  %460 = vst [vmem:[%s1683_s28 + $0x78] sm:$0xff] %v444_v59  ;;  %v480_v18 = vmax.f32 %v472_v29, %v479_v5  ;;  %v467_v42 = vsel %vm1973_vm0, %v923_v6, 0.0  ;;  %v673_v16 = vpop.xlane.xlu1 %672  ;;  %v732_v11 = vmul.f32 %v1772_v62, %v1229_v24  ;;  %v733_v0 = vmul.f32 %v1772_v62, %v1232_v25  ;;  %v1978_v33 = vld [vmem:[#allocation8_spill] sm:$0xff]  ;;  %v1980_v5 = vld [vmem:[#allocation10_spill] sm:$0xff] }
 0x19e   : > { %v477_v31 = vsel %vm239_vm6, %v467_v42, -inf  ;;  %v678_v20 = vshll.u32 %v677_v36, 16  ;;  %457 = vst [vmem:[%s1683_s28 + $0x60] sm:$0xff] %v441_v19  ;;  %458 = vst [vmem:[%s1683_s28 + $0x68] sm:$0xff] %v442_v23  ;;  %v1793_v1 = vsel %vm706_vm8, 1.0, %v1086_v37  ;;  %v650_v44 = vcvt.f32.s32 %v647_v51 }
 0x19f   : > { %v478_v21 = vmax.f32 %v471_v32, %v477_v31  ;;  %v660_v50 = vpop.xlane.xlu0 %659  ;;  %v665_v24 = vshll.u32 %v664_v48, 16  ;;  %951 = vst [vmem:[%s1683_s28 + $0x90] sm:$0xff] %v732_v11  ;;  %952 = vst [vmem:[%s1683_s28 + $0x98] sm:$0xff] %v733_v0  ;;  %v730_v25 = vmul.f32 %v1793_v1, %v1235_v26  ;;  %v731_v34 = vmul.f32 %v1793_v1, %v1238_v27  ;;  %v1017_v11 = vld [vmem:[%s1162_s25 + $0xf0] sm:$0xff] }
 0x1a0   : > { %v637_v36 = vcvt.f32.s32 %v634_v7  ;;  %v481_v45 = vmax.f32 %v474_v28, %v476_v15  ;;  %v653_v13 = vadd.s32 %v1697_v17, %v650_v44  ;;  %v676_v57 = vcvt.f32.s32 %v673_v16 }
 0x1a1   : > { %v482_v12 = vmax.f32 %v478_v21, %v480_v18  ;;  %v699_v3 = vpop.xlane.xlu1 %698  ;;  %949 = vst [vmem:[%s1683_s28 + $0x80] sm:$0xff] %v730_v25  ;;  %950 = vst [vmem:[%s1683_s28 + $0x88] sm:$0xff] %v731_v34  ;;  %v663_v48 = vcvt.f32.s32 %v660_v50  ;;  %v690_v41 = vcvt.f32.s32 %v1977_v39  ;;  %v1981_v18 = vld [vmem:[#allocation11_spill] sm:$0xff]  ;;  %vm1982_vm9 = vcmp.eq.s32.totalorder %v1289_v53, %v1286_v52 }
 0x1a2   : > { %v640_v43 = vadd.s32 %v1703_v9, %v637_v36  ;;  %v702_v26 = vcvt.f32.s32 %v699_v3  ;;  %vm709_vm13 = vcmp.lt.s32.totalorder %v653_v13, 32  ;;  %v679_v27 = vadd.s32 %v678_v20, %v676_v57  ;;  %v1018_v20 = vld [vmem:[%s1162_s25 + $0xf8] sm:$0xff] }
 0x1a3   : > { %v483_v63 = vmax.f32 %v481_v45, %v482_v12  ;;  %v944_v10 = vsel %vm709_vm13, 1.0, %v1086_v37  ;;  %v666_v17 = vadd.s32 %v665_v24, %v663_v48  ;;  %v686_v23 = vpop.xlane.xlu0 %685  ;;  %v691_v44 = vshll.u32 %v690_v41, 16 }
 0x1a4   : > { %vm708_vm10 = vcmp.lt.s32.totalorder %v640_v43, 32  ;;  %v705_v46 = vadd.s32 %v704_v8, %v702_v26  ;;  %v736_v47 = vmul.f32 %v944_v10, %v1245_v30  ;;  %v737_v38 = vmul.f32 %v944_v10, %v1974_v35  ;;  %v1019_v43 = vld [vmem:[%s1162_s25 + $0xe0] sm:$0xff]  ;;  %v1020_v26 = vld [vmem:[%s1162_s25 + $0xe8] sm:$0xff] }
 0x1a5   : > { %v484_v22 = vrot.slane %v483_v63, 4  ;;  %v943_v9 = vsel %vm708_vm10, 1.0, %v1086_v37  ;;  %vm711_vm3 = vcmp.lt.s32.totalorder %v679_v27, 32  ;;  %vm710_vm12 = vcmp.lt.s32.totalorder %v666_v17, 32 }
 0x1a6   : > { %955 = vst [vmem:[%s1683_s28 + $0xb0] sm:$0xff] %v736_v47  ;;  %956 = vst [vmem:[%s1683_s28 + $0xb8] sm:$0xff] %v737_v38  ;;  %v734_v29 = vmul.f32 %v943_v9, %v1975_v4  ;;  %v735_v15 = vmul.f32 %v943_v9, %v1976_v14  ;;  %v946_v51 = vsel %vm711_vm3, 1.0, %v1086_v37  ;;  %v945_v30 = vsel %vm710_vm12, 1.0, %v1086_v37 }
 0x1a7   : > { %v485_v2 = vmax.f32 %v483_v63, %v484_v22  ;;  %vm713_vm4 = vcmp.lt.s32.totalorder %v705_v46, 32  ;;  %v740_v59 = vmul.f32 %v946_v51, %v1978_v33  ;;  %v741_v7 = vmul.f32 %v946_v51, %v1979_v40 }
 0x1a8   : > { %953 = vst [vmem:[%s1683_s28 + $0xa0] sm:$0xff] %v734_v29  ;;  %954 = vst [vmem:[%s1683_s28 + $0xa8] sm:$0xff] %v735_v15  ;;  %v738_v6 = vmul.f32 %v945_v30, %v1980_v5  ;;  %v739_v19 = vmul.f32 %v945_v30, %v1981_v18  ;;  %v948_v16 = vsel %vm713_vm4, 1.0, %v1086_v37  ;;  %v768_v32 = vsel %vm1982_vm9, %v946_v51, 0.0 }
 0x1a9   : > { %v486_v28 = vrot.slane %v485_v2, 2  ;;  %959 = vst [vmem:[%s1683_s28 + $0xd0] sm:$0xff] %v740_v59  ;;  %960 = vst [vmem:[%s1683_s28 + $0xd8] sm:$0xff] %v741_v7  ;;  %v767_v31 = vsel %vm1983_vm11, %v945_v30, 0.0  ;;  %v744_v0 = vmul.f32 %v1017_v11, %v948_v16  ;;  %v745_v21 = vmul.f32 %v1018_v20, %v948_v16 }
 0x1aa   : > { %957 = vst [vmem:[%s1683_s28 + $0xc0] sm:$0xff] %v738_v6  ;;  %958 = vst [vmem:[%s1683_s28 + $0xc8] sm:$0xff] %v739_v19  ;;  %v770_v50 = vsel %vm1984_vm2, %v948_v16, 0.0  ;;  %v689_v24 = vcvt.f32.s32 %v686_v23  ;;  %vm1985_vm1 = vcmp.eq.s32.totalorder %v1295_v55, %v1286_v52  ;;  %vm1986_vm15 = vcmp.eq.s32.totalorder %v1280_v49, %v1286_v52 }
 0x1ab   : > { %v487_v42 = vmax.f32 %v485_v2, %v486_v28  ;;  %v764_v25 = vsel %vm1985_vm1, %v1772_v62, 0.0  ;;  %v763_v56 = vsel %vm1986_vm15, %v1793_v1, 0.0  ;;  %vm1987_vm5 = vcmp.eq.s32.totalorder %v1292_v54, %v1286_v52  ;;  %963 = vst [vmem:[%s1683_s28 + $0xf0] sm:$0xff] %v744_v0  ;;  %964 = vst [vmem:[%s1683_s28 + $0xf8] sm:$0xff] %v745_v21 }
 0x1ac   : > { %v766_v34 = vsel %vm1987_vm5, %v944_v10, 0.0  ;;  %vm490_vm14 = vcmask 516096   ;;  %v777_v60 = vsel %vm239_vm6, %v768_v32, -inf  ;;  %v775_v36 = vsel %vm239_vm6, %v767_v31, -inf }
 0x1ad   : > { %v488_v53 = vrot.slane %v487_v42, 1  ;;  %v692_v45 = vadd.s32 %v691_v44, %v689_v24  ;;  %v781_v62 = vsel %vm239_vm6, %v770_v50, -inf  ;;  %v772_v49 = vsel %vm239_vm6, %v764_v25, -inf }
 0x1ae   : > { %v771_v1 = vsel %vm239_vm6, %v763_v56, -inf  ;;  %vm1988_vm7 = vcmp.eq.s32.totalorder %v1303_v58, %v1286_v52  ;;  %v774_v12 = vsel %vm239_vm6, %v766_v34, -inf  ;;  %v778_v13 = vmax.f32 %v772_v49, %v777_v60 }
 0x1af   : > { %v489_v55 = vmax.f32 %v487_v42, %v488_v53  ;;  %v765_v54 = vsel %vm1988_vm7, %v943_v9, 0.0  ;;  %vm712_vm8 = vcmp.lt.s32.totalorder %v692_v45, 32  ;;  %v776_v57 = vmax.f32 %v771_v1, %v775_v36 }
 0x1b0   : > { %v947_v3 = vsel %vm712_vm8, 1.0, %v1086_v37  ;;  %v782_v8 = vmax.f32 %v774_v12, %v781_v62  ;;  %v773_v27 = vsel %vm239_vm6, %v765_v54, -inf }
 0x1b1   : > { %491 = vst.msk [vmem:[%s148_s3] sm:$0x1] %vm490_vm14, %v489_v55  ;;  %v742_v48 = vmul.f32 %v1019_v43, %v947_v3  ;;  %v743_v63 = vmul.f32 %v1020_v26, %v947_v3  ;;  %v769_v58 = vsel %vm1973_vm0, %v947_v3, 0.0  ;;  %v783_v46 = vmax.f32 %v776_v57, %v778_v13 }
 0x1b2   : > { %v779_v10 = vsel %vm239_vm6, %v769_v58, -inf }
 0x1b3   : > { %961 = vst [vmem:[%s1683_s28 + $0xe0] sm:$0xff] %v742_v48  ;;  %962 = vst [vmem:[%s1683_s28 + $0xe8] sm:$0xff] %v743_v63  ;;  %v780_v17 = vmax.f32 %v773_v27, %v779_v10 }
 0x1b5   : > { %v784_v37 = vmax.f32 %v780_v17, %v782_v8 }
 0x1b7   : > { %v785_v22 = vmax.f32 %v783_v46, %v784_v37 }
 0x1b9   : > { %v786_v47 = vrot.slane %v785_v22, 4 }
 0x1bb   : > { %v787_v35 = vmax.f32 %v785_v22, %v786_v47 }
 0x1bd   : > { %v788_v38 = vrot.slane %v787_v35, 2 }
 0x1bf   : > { %v789_v9 = vmax.f32 %v787_v35, %v788_v38 }
 0x1c1   : > { %v790_v52 = vrot.slane %v789_v9, 1 }
 0x1c3   : > { %v791_v61 = vmax.f32 %v789_v9, %v790_v52 }
 0x1c5   : > { %965 = vst.msk [vmem:[%s148_s3 + $0x1] sm:$0x1] %vm490_vm14, %v791_v61 }
 0x1c6   : > { %1034 = shalt.err (!%p1031_p3)
}
 0x1c7   : > { %s1035_s22 = scalar_lea.hbm %s1882_s8, 32  ;;  %s1039_s25 = scalar_lea.hbm %s1932_s2, 64 }
 0x1c8   : > { %p1036_p4 = scmp.ne.s32.totalorder %s1882_s8, %s1035_s22  ;;  %p1040_p9 = scmp.lt.u32.totalorder %s1882_s8, %s1932_s2 }
 0x1c9   : > { %p1041_p10 = scmp.lt.u32.totalorder %s1039_s25, %s1035_s22  ;;  %p1043_p12 = scmp.lt.u32.totalorder %s1035_s22, %s1882_s8 }
 0x1ca   : > { %p1037_p7 = pnand %p1036_p4, %p1143_p5 }
 0x1cb   : > { %p1042_p11 = por %p1041_p10, %p1040_p9 }
 0x1cc   : > { %p1038_p8 = pneg %p1037_p7 }
 0x1cd   : > { %p1044_p13 = por %p1043_p12, %p1042_p11 }
 0x1cf   : > { %p1045_p0 = pnand %p1044_p13, %p1038_p8 }
 0x1d1   : > { %1048 = shalt.err (!%p1045_p0)
}
 0x1d2   : > { %s1088_s28 = smov 16   ;;  %s1089_s29 = smov 1  }
 0x1d3   : > { %974 = dma.vmem_to_hbm [thread:$0]  (%p1143_p5), %s1884_s5, 32, %s1882_s8, %s1889_s14, %s1088_s28, %s1088_s28, %s1089_s29  }
 0x1d4 PF: > { %p980_p1 = scmp.ge.s32.totalorder %s1083_s12, 2  ;;  %s842_s30 = sand.u32 1, %s1071_s9  }
 0x1d5   : > { %s843_s3 = scalar_lea.sflag [#allocation3], %s842_s30 }
 0x1d6   : > { %p977_p2 = pnand %p980_p1, %p1147_p6 }
 0x1d8   : > { %1066 = dma.done.wait (!%p977_p2), %s843_s3, 32  }
 0x1d9   : > { %1068 = vsyncadd (!%p977_p2), %s843_s3, 4294967264  ;;  %p13_p3 = scmp.ge.s32.totalorder %s1130_s15, 4   ;;  %s1989_s9 = smov %s1075_s10 }
 0x1da   : > { %s1990_s10 = smov %s1079_s11  ;;  %s1991_s11 = smov %s1141_s18 }
 0x1db   : > { %s1992_s12 = smov %s1130_s15  ;;  %15 = sbr.rel (!%p13_p3) target bundleno = 3 (0x3), region = 74 }
 0x1e2   :  { %848 = vsyncpa [#allocation3], 1 }
 0x1e3   :  { %850 = vsyncpa [#allocation3 + $0x1], 1 }

</bundles_post_ra>
